<compile_context>
chip_gen: v6e
topology: v6e:2x2x1
jax: 0.10.0
libtpu: 0.0.40
codegen_flags: <defaults>
</compile_context>

<pallas_src>
import jax
import jax.numpy as jnp
from jax.experimental import pallas as pl
from jax.experimental.pallas import tpu as pltpu


def _round_up(x, m):
    return (x + m - 1) // m * m


def _mlp_kernel(x_ref, w1_ref, wmid_ref, b_ref, wu_ref, o_ref):
    # x_ref   : (TB, 2N)    compute dtype (bf16 or f32) -- [x_start | x_goal]
    # w1_ref  : (2N, H)     block_diag(W1_start, W1_goal), zero-padded to H
    # wmid_ref: (2, H, H)   [block_diag(W2s,W2g), block_diag(W3s,W3g)]
    # b_ref   : (3, H)      f32 biases [b1 | b2 | b3], zero-padded
    # wu_ref  : (H, N)      [Wu^T ; Wu^T ; 0] -- row-doubling sums vstart+vgoal
    # o_ref   : (TB, N)     f32
    cdt = w1_ref.dtype

    h = jnp.dot(x_ref[...], w1_ref[...], preferred_element_type=jnp.float32)
    h = jnp.maximum(h + b_ref[0:1, :], 0.0)

    h = jnp.dot(h.astype(cdt), wmid_ref[0], preferred_element_type=jnp.float32)
    h = jnp.maximum(h + b_ref[1:2, :], 0.0)

    v = jnp.dot(h.astype(cdt), wmid_ref[1], preferred_element_type=jnp.float32)
    v = v + b_ref[2:3, :]

    o_ref[...] = jnp.dot(v.astype(cdt), wu_ref[...],
                         preferred_element_type=jnp.float32).astype(o_ref.dtype)


def pack_params(p, *, compute_dtype=jnp.bfloat16):
    """Pack per-branch params into fused, lane-padded operands (once, offline)."""
    N, Ne = p["w1s"].shape
    H = _round_up(2 * Ne, 128)  # fused hidden width, padded to full lanes

    w1 = jnp.zeros((2 * N, H), jnp.float32)
    w1 = w1.at[:N, :Ne].set(p["w1s"]).at[N:, Ne:2 * Ne].set(p["w1g"])

    wmid = jnp.zeros((2, H, H), jnp.float32)
    wmid = wmid.at[0, :Ne, :Ne].set(p["w2s"]).at[0, Ne:2 * Ne, Ne:2 * Ne].set(p["w2g"])
    wmid = wmid.at[1, :Ne, :Ne].set(p["w3s"]).at[1, Ne:2 * Ne, Ne:2 * Ne].set(p["w3g"])

    b = jnp.zeros((3, H), jnp.float32)
    b = b.at[0, :Ne].set(p["b1s"]).at[0, Ne:2 * Ne].set(p["b1g"])
    b = b.at[1, :Ne].set(p["b2s"]).at[1, Ne:2 * Ne].set(p["b2g"])
    b = b.at[2, :Ne].set(p["b3s"]).at[2, Ne:2 * Ne].set(p["b3g"])

    wu = jnp.zeros((H, N), jnp.float32)
    wu = wu.at[:Ne].set(p["wu"]).at[Ne:2 * Ne].set(p["wu"])

    return (w1.astype(compute_dtype),
            wmid.astype(compute_dtype),
            b,                              # biases stay f32 (VPU add in f32)
            wu.astype(compute_dtype))


def mlp_forward(inputs, packed, *, tb=128):
    """inputs: (B, 2, num_nodes) float32 -> (B, num_nodes) float32."""
    B, two, N = inputs.shape
    assert two == 2
    w1, wmid, b, wu = packed
    K, H = w1.shape
    assert K == 2 * N
    cdt = w1.dtype

    # Contiguous reshape (no strided copies): row b = [x_start_b | x_goal_b].
    x = inputs.reshape(B, 2 * N).astype(cdt)

    # Batch tile: sublane-aligned, capped by the (padded) batch itself.
    tb = min(tb, _round_up(B, 8))
    Bp = _round_up(B, tb)
    if Bp != B:
        x = jnp.pad(x, ((0, Bp - B), (0, 0)))
    nb = Bp // tb

    out = pl.pallas_call(
        _mlp_kernel,
        out_shape=jax.ShapeDtypeStruct((Bp, N), jnp.float32),
        grid=(nb,),
        in_specs=[
            pl.BlockSpec((tb, 2 * N), lambda i: (i, 0)),        # pipelined x tile
            pl.BlockSpec((2 * N, H), lambda i: (0, 0)),         # resident weights
            pl.BlockSpec((2, H, H), lambda i: (0, 0, 0)),
            pl.BlockSpec((3, H), lambda i: (0, 0)),
            pl.BlockSpec((H, N), lambda i: (0, 0)),
        ],
        out_specs=pl.BlockSpec((tb, N), lambda i: (i, 0)),
        compiler_params=pltpu.CompilerParams(
            dimension_semantics=("parallel",)),                 # megacore on v7x
    )(x, w1, wmid, b, wu)
    return out[:B]


def init_params(key, num_nodes, Ne):
    """nn.Linear-style init (uniform +/- 1/sqrt(fan_in)); weights stored (in, out)."""
    ks = jax.random.split(key, 13)
    u = lambda k, shape, fan_in: jax.random.uniform(
        k, shape, jnp.float32, -1.0 / jnp.sqrt(float(fan_in)),
        1.0 / jnp.sqrt(float(fan_in)))
    return {
        # start branch
        "w1s": u(ks[0], (num_nodes, Ne), num_nodes), "b1s": u(ks[1], (Ne,), num_nodes),
        "w2s": u(ks[2], (Ne, Ne), Ne),               "b2s": u(ks[3], (Ne,), Ne),
        "w3s": u(ks[4], (Ne, Ne), Ne),               "b3s": u(ks[5], (Ne,), Ne),
        # goal branch
        "w1g": u(ks[6], (num_nodes, Ne), num_nodes), "b1g": u(ks[7], (Ne,), num_nodes),
        "w2g": u(ks[8], (Ne, Ne), Ne),               "b2g": u(ks[9], (Ne,), Ne),
        "w3g": u(ks[10], (Ne, Ne), Ne),              "b3g": u(ks[11], (Ne,), Ne),
        # Wu (no bias), stored pre-transposed: (Ne, num_nodes)
        "wu": u(ks[12], (Ne, num_nodes), Ne),
    }


def reference_forward(inputs, p):
    def branch(x, w1, b1, w2, b2, w3, b3):
        h = jnp.maximum(x @ w1 + b1, 0.0)
        h = jnp.maximum(h @ w2 + b2, 0.0)
        return h @ w3 + b3

    vstart = branch(inputs[:, 0, :], p["w1s"], p["b1s"], p["w2s"], p["b2s"],
                    p["w3s"], p["b3s"])
    vgoal = branch(inputs[:, 1, :], p["w1g"], p["b1g"], p["w2g"], p["b2g"],
                   p["w3g"], p["b3g"])
    return (vstart + vgoal) @ p["wu"]


if __name__ == "__main__":
    key = jax.random.PRNGKey(0)
    k_in, k_par = jax.random.split(key)

    batch, num_nodes, Ne = 20, 128, 32      # small; batch not a tile multiple
    inputs = jax.random.normal(k_in, (batch, 2, num_nodes), jnp.float32)
    params = init_params(k_par, num_nodes, Ne)
    ref = reference_forward(inputs, params)

    # f32 operands: exact match against the reference (tb=8 -> 3 grid steps,
    # exercises the batch grid + padding path).
    packed_f32 = pack_params(params, compute_dtype=jnp.float32)
    out_f32 = jax.block_until_ready(mlp_forward(inputs, packed_f32, tb=8))
    assert out_f32.shape == (batch, num_nodes)
    assert jnp.allclose(out_f32, ref, atol=1e-4, rtol=1e-4)

    # bf16 dot operands with f32 accumulation: fast MXU path on v6e/v7x.
    packed_bf16 = pack_params(params, compute_dtype=jnp.bfloat16)
    out_bf16 = jax.block_until_ready(mlp_forward(inputs, packed_bf16, tb=8))
    assert out_bf16.shape == (batch, num_nodes)
    assert jnp.allclose(out_bf16, ref, atol=2e-2, rtol=2e-2)

    print("KERNEL_OK")
</pallas_src>

<mosaic_0001>
module attributes {stable_mosaic.version = 11 : i64} {
  func.func @_mlp_kernel(%arg0: i32, %arg1: memref<8x256xf32, #tpu.memory_space<vmem>>, %arg2: memref<256x128xf32, #tpu.memory_space<vmem>>, %arg3: memref<2x128x128xf32, #tpu.memory_space<vmem>>, %arg4: memref<3x128xf32, #tpu.memory_space<vmem>>, %arg5: memref<128x128xf32, #tpu.memory_space<vmem>>, %arg6: memref<8x128xf32, #tpu.memory_space<vmem>>) attributes {dimension_semantics = [#tpu.dimension_semantics<parallel>], iteration_bounds = array<i64: 3>, scalar_prefetch = 0 : i64, scratch_operands = 0 : i64, tpu.core_type = #tpu.core_type<tc>, window_params = [{transform_indices = @transform_0, window_bounds = array<i64: 8, 256>}, {pipeline_mode = #tpu.pipeline_mode<synchronous>, transform_indices = @transform_1, window_bounds = array<i64: 256, 128>}, {pipeline_mode = #tpu.pipeline_mode<synchronous>, transform_indices = @transform_2, window_bounds = array<i64: 2, 128, 128>}, {pipeline_mode = #tpu.pipeline_mode<synchronous>, transform_indices = @transform_3, window_bounds = array<i64: 3, 128>}, {pipeline_mode = #tpu.pipeline_mode<synchronous>, transform_indices = @transform_4, window_bounds = array<i64: 128, 128>}, {transform_indices = @transform_5, window_bounds = array<i64: 8, 128>}]} {
    %c0 = arith.constant 0 : index
    %c0_0 = arith.constant 0 : index
    %0 = vector.load %arg1[%c0, %c0_0] : memref<8x256xf32, #tpu.memory_space<vmem>>, vector<8x256xf32>
    %c0_1 = arith.constant 0 : index
    %c0_2 = arith.constant 0 : index
    %1 = vector.load %arg2[%c0_1, %c0_2] : memref<256x128xf32, #tpu.memory_space<vmem>>, vector<256x128xf32>
    %cst = arith.constant dense<0.000000e+00> : vector<8x128xf32>
    %2 = tpu.matmul %0, %1, %cst {dimension_numbers = #tpu.dot_dimension_numbers<[1], [0], [0], [1], [0, 0, 1, 1], [], []>} : vector<8x256xf32>, vector<256x128xf32>, vector<8x128xf32> -> vector<8x128xf32>
    %c0_3 = arith.constant 0 : index
    %c0_4 = arith.constant 0 : index
    %3 = vector.load %arg4[%c0_3, %c0_4] : memref<3x128xf32, #tpu.memory_space<vmem>>, vector<1x128xf32>
    %4 = vector.broadcast %3 : vector<1x128xf32> to vector<8x128xf32>
    %5 = arith.addf %2, %4 : vector<8x128xf32>
    %cst_5 = arith.constant 0.000000e+00 : f32
    %6 = vector.broadcast %cst_5 : f32 to vector<8x128xf32>
    %7 = arith.maximumf %5, %6 : vector<8x128xf32>
    %c0_6 = arith.constant 0 : index
    %c0_7 = arith.constant 0 : index
    %c0_8 = arith.constant 0 : index
    %8 = vector.load %arg3[%c0_6, %c0_7, %c0_8] : memref<2x128x128xf32, #tpu.memory_space<vmem>>, vector<1x128x128xf32>
    %9 = vector.shape_cast %8 : vector<1x128x128xf32> to vector<128x128xf32>
    %cst_9 = arith.constant dense<0.000000e+00> : vector<8x128xf32>
    %10 = tpu.matmul %7, %9, %cst_9 {dimension_numbers = #tpu.dot_dimension_numbers<[1], [0], [0], [1], [0, 0, 1, 1], [], []>} : vector<8x128xf32>, vector<128x128xf32>, vector<8x128xf32> -> vector<8x128xf32>
    %c1 = arith.constant 1 : index
    %c0_10 = arith.constant 0 : index
    %11 = vector.load %arg4[%c1, %c0_10] : memref<3x128xf32, #tpu.memory_space<vmem>>, vector<1x128xf32>
    %12 = vector.broadcast %11 : vector<1x128xf32> to vector<8x128xf32>
    %13 = arith.addf %10, %12 : vector<8x128xf32>
    %cst_11 = arith.constant 0.000000e+00 : f32
    %14 = vector.broadcast %cst_11 : f32 to vector<8x128xf32>
    %15 = arith.maximumf %13, %14 : vector<8x128xf32>
    %c1_12 = arith.constant 1 : index
    %c0_13 = arith.constant 0 : index
    %c0_14 = arith.constant 0 : index
    %16 = vector.load %arg3[%c1_12, %c0_13, %c0_14] : memref<2x128x128xf32, #tpu.memory_space<vmem>>, vector<1x128x128xf32>
    %17 = vector.shape_cast %16 : vector<1x128x128xf32> to vector<128x128xf32>
    %cst_15 = arith.constant dense<0.000000e+00> : vector<8x128xf32>
    %18 = tpu.matmul %15, %17, %cst_15 {dimension_numbers = #tpu.dot_dimension_numbers<[1], [0], [0], [1], [0, 0, 1, 1], [], []>} : vector<8x128xf32>, vector<128x128xf32>, vector<8x128xf32> -> vector<8x128xf32>
    %c2 = arith.constant 2 : index
    %c0_16 = arith.constant 0 : index
    %19 = vector.load %arg4[%c2, %c0_16] : memref<3x128xf32, #tpu.memory_space<vmem>>, vector<1x128xf32>
    %20 = vector.broadcast %19 : vector<1x128xf32> to vector<8x128xf32>
    %21 = arith.addf %18, %20 : vector<8x128xf32>
    %c0_17 = arith.constant 0 : index
    %c0_18 = arith.constant 0 : index
    %22 = vector.load %arg5[%c0_17, %c0_18] : memref<128x128xf32, #tpu.memory_space<vmem>>, vector<128x128xf32>
    %cst_19 = arith.constant dense<0.000000e+00> : vector<8x128xf32>
    %23 = tpu.matmul %21, %22, %cst_19 {dimension_numbers = #tpu.dot_dimension_numbers<[1], [0], [0], [1], [0, 0, 1, 1], [], []>} : vector<8x128xf32>, vector<128x128xf32>, vector<8x128xf32> -> vector<8x128xf32>
    %c0_20 = arith.constant 0 : index
    %c0_21 = arith.constant 0 : index
    %24 = vector.load %arg6[%c0_20, %c0_21] : memref<8x128xf32, #tpu.memory_space<vmem>>, vector<8x128xf32>
    tpu.vector_store %arg6[%c0_20, %c0_21], %23 {strides = array<i32>} : memref<8x128xf32, #tpu.memory_space<vmem>>, vector<8x128xf32>,
    return
  }
  func.func @transform_0(%arg0: i32) -> (i32, i32) {
    %c0_i32 = arith.constant 0 : i32
    %c0_i32_0 = arith.constant 0 : i32
    return %arg0, %c0_i32 : i32, i32
  }
  func.func @transform_1(%arg0: i32) -> (i32, i32) {
    %c0_i32 = arith.constant 0 : i32
    %c0_i32_0 = arith.constant 0 : i32
    %c0_i32_1 = arith.constant 0 : i32
    return %c0_i32, %c0_i32_0 : i32, i32
  }
  func.func @transform_2(%arg0: i32) -> (i32, i32, i32) {
    %c0_i32 = arith.constant 0 : i32
    %c0_i32_0 = arith.constant 0 : i32
    %c0_i32_1 = arith.constant 0 : i32
    %c0_i32_2 = arith.constant 0 : i32
    return %c0_i32, %c0_i32_0, %c0_i32_1 : i32, i32, i32
  }
  func.func @transform_3(%arg0: i32) -> (i32, i32) {
    %c0_i32 = arith.constant 0 : i32
    %c0_i32_0 = arith.constant 0 : i32
    %c0_i32_1 = arith.constant 0 : i32
    return %c0_i32, %c0_i32_0 : i32, i32
  }
  func.func @transform_4(%arg0: i32) -> (i32, i32) {
    %c0_i32 = arith.constant 0 : i32
    %c0_i32_0 = arith.constant 0 : i32
    %c0_i32_1 = arith.constant 0 : i32
    return %c0_i32, %c0_i32_0 : i32, i32
  }
  func.func @transform_5(%arg0: i32) -> (i32, i32) {
    %c0_i32 = arith.constant 0 : i32
    %c0_i32_0 = arith.constant 0 : i32
    return %arg0, %c0_i32 : i32, i32
  }
}

</mosaic_0001>

<bundles_post_ra>
// kernel: tpu_custom_call.1
= control target key start
LH: loop header
LB: loop body
LE: loop exit
PB: predicated region body
PF: predicated region fallthrough
CT: control target
= control target key end

     0   :  { %10 = vsyncpa [#allocation3], 0  ;;  %s1548_s0 = inlined_call_operand.hbm [shape: f32[24,256], index: 0, kind: input, shape index: {}]   ;;  %s1549_s1 = inlined_call_operand.hbm [shape: f32[256,128], index: 1, kind: input, shape index: {}]   ;;  %s1550_s2 = inlined_call_operand.hbm [shape: f32[2,128,128], index: 2, kind: input, shape index: {}]   ;;  %s1551_s3 = inlined_call_operand.vmem [shape: f32[3,128], index: 3, kind: input, shape index: {}]   ;;  %s1552_s4 = inlined_call_operand.hbm [shape: f32[128,128], index: 4, kind: input, shape index: {}]   ;;  %s1553_s5 = inlined_call_operand.hbm [shape: f32[24,128], index: 5, kind: output, shape index: {}]  }
   0x1   :  { %12 = vsyncpa [#allocation3 + $0x1], 0 }
   0x2   :  { %13 = vsyncpa [#allocation6], 0 }
   0x3   :  { %14 = vsyncpa [#allocation9], 0 }
   0x4   :  { %15 = vsyncpa [#allocation4], 0 }
   0x5   :  { %17 = vsyncpa [#allocation4 + $0x1], 0  ;;  %s1293_s18 = smov 0   ;;  %s1295_s19 = smov 0  }
   0x6   :  { %s1297_s20 = smov 0   ;;  %s1299_s21 = smov 0  }
   0x7 LB: > { %s1314_s22 = sadd.s32 4294967295, %s1252_s21   ;;  %s779_s23 = sadd.s32 4294967294, %s1252_s21   ;;  %s1252_s21 = sphi %s1299_s21, %s1576_s21   ;;  %s1248_s20 = sphi %s1297_s20, %s1575_s20   ;;  %s1244_s19 = sphi %s1295_s19, %s1574_s19   ;;  %s1240_s18 = sphi %s1293_s18, %s1573_s18  }
   0x8   : > { %p43_p0 = scmp.ne.s32.totalorder %s1244_s19, %s1240_s18  ;;  %p1554_p1 = scmp.eq.s32.totalorder %s1314_s22, 0 }
   0x9   : > { %p157_p3 = scmp.eq.s32.totalorder %s779_s23, 2  ;;  %p780_p5 = scmp.ge.s32.totalorder %s1252_s21, 1 }
   0xa   : > { %p1323_p4 = por %p1554_p1, %p43_p0  ;;  %p164_p7 = scmp.lt.s32.totalorder %s1252_s21, 4 }
   0xb   : > { %p1328_p6 = por %p157_p3, %p43_p0  ;;  %s1254_s27 = smov [#allocation5]  }
   0xc   : > { %s1558_s24 = scalar_select %p1323_p4, 1, 0 }
   0xd   : > { %s1559_s25 = scalar_select %p1328_p6, 1, 0 }
   0xe   : > { %p1333_p8 = pnand %p780_p5, %p164_p7  ;;  %s176_s28 = sshll.u32 %s1254_s27, 4  ;;  %s177_s28 = int_to_ptr.vmem [resolvable:$true] %s176_s28 }
   0xf   : > { %s1255_s30 = smov [#allocation7]   ;;  %s1256_s7 = smov [#allocation8]  }
  0x10   : > { %s1560_s26 = scalar_select %p1333_p8, 1, 0 }
  0x11   : > { %p1009_p9 = pneg %p1333_p8  ;;  %s189_s6 = sshll.u32 %s1255_s30, 4  ;;  %s190_s6 = int_to_ptr.vmem [resolvable:$true] %s189_s6 }
  0x12   : > { %s205_s8 = sshll.u32 %s1256_s7, 4  ;;  %s1085_s9 = scalar_lea.vmem %s177_s28, 4096  ;;  %s206_s8 = int_to_ptr.vmem [resolvable:$true] %s205_s8 }
  0x13   : > { %p1341_p10 = pnand %p1009_p9, %p1554_p1  ;;  %p1086_p12 = scmp.ne.s32.totalorder %s177_s28, %s1085_s9 }
  0x14   : > { %p1093_p3 = scmp.lt.s32.totalorder %s177_s28, %s177_s28  ;;  %p1094_p5 = scmp.lt.s32.totalorder %s1085_s9, %s1085_s9 }
  0x15   : > { %p1076_p11 = pneg %p1341_p10 }
  0x16   : > { %p1095_p7 = por %p1094_p5, %p1093_p3 }
  0x17   : > { %p1088_p13 = pnand %p1086_p12, %p1076_p11 }
  0x19   : > { %p1089_p0 = pneg %p1088_p13 }
  0x1b   : > { %p1096_p9 = pnand %p1095_p7, %p1089_p0 }
  0x1d   : > { %1099 = shalt.err (!%p1096_p9)
}
  0x1e   : > { %s1257_s10 = smov 128   ;;  %s1258_s11 = smov 8  }
  0x1f   : > { %1012 = dma.hbm_to_vmem [thread:$0]  (!%p1341_p10), %s1549_s1, 4096, %s177_s28, [#allocation6], %s1257_s10, %s1257_s10, %s1258_s11  }
  0x20   : > { %s1111_s14 = scalar_lea.vmem %s190_s6, 4096  ;;  %p1119_p2 = scmp.lt.s32.totalorder %s190_s6, %s190_s6 }
  0x21   : > { %p1112_p1 = scmp.ne.s32.totalorder %s190_s6, %s1111_s14  ;;  %p1120_p6 = scmp.lt.s32.totalorder %s1111_s14, %s1111_s14 }
  0x23   : > { %p1114_p12 = pnand %p1112_p1, %p1076_p11  ;;  %p1121_p3 = por %p1120_p6, %p1119_p2 }
  0x25   : > { %p1115_p13 = pneg %p1114_p12 }
  0x27   : > { %p1122_p0 = pnand %p1121_p3, %p1115_p13 }
  0x29   : > { %1125 = shalt.err (!%p1122_p0)
}
  0x2a   : > { %1015 = dma.hbm_to_vmem [thread:$0]  (!%p1341_p10), %s1550_s2, 4096, %s190_s6, [#allocation6], %s1257_s10, %s1257_s10, %s1258_s11  }
  0x2b   : > { %s1137_s17 = scalar_lea.vmem %s206_s8, 2048  ;;  %p1145_p9 = scmp.lt.s32.totalorder %s206_s8, %s206_s8 }
  0x2c   : > { %p1138_p5 = scmp.ne.s32.totalorder %s206_s8, %s1137_s17  ;;  %p1146_p12 = scmp.lt.s32.totalorder %s1137_s17, %s1137_s17 }
  0x2e   : > { %p1140_p7 = pnand %p1138_p5, %p1076_p11  ;;  %p1147_p4 = por %p1146_p12, %p1145_p9 }
  0x30   : > { %p1141_p1 = pneg %p1140_p7 }
  0x32   : > { %p1148_p2 = pnand %p1147_p4, %p1141_p1 }
  0x34   : > { %1151 = shalt.err (!%p1148_p2)
}
  0x35   : > { %1018 = dma.hbm_to_vmem [thread:$0]  (!%p1341_p10), %s1552_s4, 2048, %s206_s8, [#allocation9], %s1257_s10, %s1257_s10, %s1258_s11  }
  0x36   : > { %s1372_s28 = sadd.s32 1, %s1252_s21   ;;  %s30_s29 = sadd.s32 1, %s1248_s20 }
  0x37   : > { %s27_s30 = ssub.s32 %s1252_s21, %s1372_s28  ;;  %p37_p6 = scmp.ne.s32.totalorder %s1248_s20, %s1244_s19 }
  0x38   : > { %p28_p4 = scmp.eq.s32.totalorder %s27_s30, 0  ;;  %p38_p11 = scmp.eq.s32.totalorder %s1252_s21, 0 }
  0x39   : > { %p1030_p13 = scmp.lt.s32.totalorder %s1252_s21, 3  ;;  %p1562_p0 = scmp.eq.s32.totalorder %s1314_s22, 2 }
  0x3a   : > { %s1382_s6 = scalar_select %p28_p4, %s1248_s20, %s30_s29  }
  0x3b   : > { %p39_p3 = por %p38_p11, %p37_p6  ;;  %p1386_p5 = por %p1562_p0, %p37_p6 }
  0x3c   : > { %s219_s9 = sand.u32 1, %s1248_s20   ;;  %s801_s12 = sshll.u32 %s1252_s21, 8 }
  0x3d   : > { %s1563_s7 = scalar_select %p1386_p5, 1, 0 }
  0x3e   : > { %s785_s8 = sshll.u32 %s219_s9, 4  ;;  %s1395_s13 = scalar_lea.hbm %s1548_s0, %s801_s12 }
  0x3f   : > { %s223_s14 = scalar_lea.vmem [#allocation2], %s785_s8  ;;  %p1397_p10 = pnand %p1030_p13, %p39_p3 }
  0x40   : > { %s231_s15 = sshll.u32 %s223_s14, 4  ;;  %s220_s17 = scalar_lea.sflag [#allocation3], %s219_s9  ;;  %s232_s15 = int_to_ptr.vmem [resolvable:$true] %s231_s15 }
  0x41   : > { %s1152_s23 = scalar_lea.hbm %s1395_s13, 256  ;;  %p1154_p1 = pneg %p1397_p10 }
  0x42   : > { %p1153_p7 = scmp.ne.s32.totalorder %s1395_s13, %s1152_s23  ;;  %s1157_s29 = scalar_lea.hbm %s1548_s0, 768 }
  0x43   : > { %p1158_p2 = scmp.lt.s32.totalorder %s1395_s13, %s1548_s0  ;;  %p1159_p4 = scmp.lt.s32.totalorder %s1157_s29, %s1152_s23 }
  0x44   : > { %p1155_p9 = pnand %p1154_p1, %p1153_p7 }
  0x45   : > { %p1160_p6 = por %p1159_p4, %p1158_p2 }
  0x46   : > { %p1156_p12 = pneg %p1155_p9 }
  0x48   : > { %p1161_p11 = pnand %p1160_p6, %p1156_p12 }
  0x4a   : > { %1164 = shalt.err (!%p1161_p11)
}
  0x4b   : > { %s1165_s10 = scalar_lea.vmem %s232_s15, 256  ;;  %s1259_s9 = smov [#allocation2]  }
  0x4c   : > { %p1166_p13 = scmp.ne.s32.totalorder %s232_s15, %s1165_s10  ;;  %s1170_s11 = sshll.u32 %s1259_s9, 4  ;;  %s1171_s11 = int_to_ptr.vmem [resolvable:$false] %s1170_s11 }
  0x4d   : > { %s1172_s14 = scalar_lea.vmem %s1171_s11, 512  ;;  %p1173_p7 = scmp.lt.s32.totalorder %s232_s15, %s1171_s11 }
  0x4e   : > { %p1168_p3 = pnand %p1166_p13, %p1154_p1  ;;  %p1174_p9 = scmp.lt.s32.totalorder %s1172_s14, %s1165_s10 }
  0x50   : > { %p1169_p0 = pneg %p1168_p3  ;;  %p1175_p5 = por %p1174_p9, %p1173_p7 }
  0x52   : > { %p1176_p8 = pnand %p1175_p5, %p1169_p0 }
  0x54   : > { %1179 = shalt.err (!%p1176_p8)
}
  0x55   : > { %1022 = dma.hbm_to_vmem [thread:$0]  (!%p1397_p10), %s1395_s13, 256, %s232_s15, %s220_s17  }
  0x56   : > { %p1565_p12 = scmp.ne.s32.totalorder %s1560_s26, 0 }
  0x57   : > { %s1418_s23 = sand.u32 (!%p1565_p12), 1, %s1244_s19   ;;  %p1566_p1 = scmp.ne.s32.totalorder (!%p1565_p12), %s1558_s24, 0 }
  0x58   : > { %240 = sbr.rel (%p1565_p12) target bundleno = 934 (0x3a6), region = 40  ;;  %s789_s27 = sshll.u32 (!%p1565_p12), %s1418_s23, 4 }
  0x59   : > { %s243_s30 = scalar_lea.sflag (!%p1565_p12), [#allocation3], %s1418_s23  ;;  %s1422_s29 = scalar_lea.vmem (!%p1565_p12), [#allocation2], %s789_s27 }
  0x5d   : > { %1223 = dma.done.wait (%p1566_p1), %s243_s30, 256  }
  0x5e   : > { %1225 = vsyncadd (%p1566_p1), %s243_s30, 4294967040  ;;  %p1567_p8 = scmp.eq.s32.totalorder %s1314_s22, 0 }
  0x60   : > { %1227 = dma.done.wait (%p1567_p8), [#allocation6], 8192   ;;  %p1568_p5 = pmov %p1567_p8 }
  0x62   : > { %1229 = vsyncadd (%p1568_p5), [#allocation6], 4294959104  ;;  %p1569_p10 = pmov %p1568_p5 }
  0x63   : > { %p1570_p2 = pmov %p1568_p5 }
  0x64   : > { %1231 = dma.done.wait (%p1569_p10), [#allocation9], 2048  }
  0x65   : > { %1233 = vsyncadd (%p1570_p2), [#allocation9], 4294965248  ;;  %v1260_v0 = vmov 0.0   ;;  %v318_v1 = vld [vmem:[#allocation5 + $0xf8] sm:$0xff]  ;;  %v317_v3 = vld [vmem:[#allocation5 + $0xf0] sm:$0xff]  ;;  %vm1261_vm0 = vmmov 0  }
  0x66   : > { %888 = vmatprep.subr.mxu1 %v1260_v0  ;;  %v302_v2 = vld [vmem:[#allocation5 + $0x78] sm:$0xff]  ;;  %802 = vmatprep.subr.mxu0 %v318_v1  ;;  %v301_v4 = vld [vmem:[#allocation5 + $0x70] sm:$0xff]  ;;  %v316_v5 = vld [vmem:[#allocation5 + $0xe8] sm:$0xff]  ;;  %s793_s12 = sshll.u32 %s1418_s23, 3  ;;  %s798_s9 = sshll.u32 %s1314_s22, 7 }
  0x67   : > { %803 = vmatpush3.msra.mxu0 %v302_v2  ;;  %v300_v6 = vld [vmem:[#allocation5 + $0x68] sm:$0xff]  ;;  %v315_v7 = vld [vmem:[#allocation5 + $0xe0] sm:$0xff]  ;;  %v314_v9 = vld [vmem:[#allocation5 + $0xd8] sm:$0xff]  ;;  %920 = vmatprep.mubr.msk.f32.mxu1 %vm1261_vm0, %v1260_v0  ;;  %s284_s8 = scalar_lea.vmem [#allocation10], %s793_s12  ;;  %s1508_s27 = scalar_lea.hbm %s1553_s5, %s798_s9 }
  0x68   : > { %804 = vmatprep.subr.mxu0 %v317_v3  ;;  %v299_v8 = vld [vmem:[#allocation5 + $0x60] sm:$0xff]  ;;  %v298_v10 = vld [vmem:[#allocation5 + $0x58] sm:$0xff]  ;;  %v313_v11 = vld [vmem:[#allocation5 + $0xd0] sm:$0xff]  ;;  %s680_s10 = sshll.u32 %s284_s8, 4  ;;  %s667_s30 = scalar_lea.sflag [#allocation4], %s1418_s23  ;;  %s1503_s10 = int_to_ptr.vmem [resolvable:$true] %s680_s10 }
  0x69   : > { %805 = vmatpush3.msra.mxu0 %v301_v4  ;;  %v297_v12 = vld [vmem:[#allocation5 + $0x50] sm:$0xff]  ;;  %v312_v13 = vld [vmem:[#allocation5 + $0xc8] sm:$0xff]  ;;  %v410_v16 = vld [vmem:[#allocation7 + $0x78] sm:$0xff]  ;;  %p1571_p6 = scmp.ne.s32.totalorder %s1563_s7, 0  ;;  %s1262_s22 = smov [#allocation10]  }
  0x6a   : > { %806 = vmatprep.subr.mxu0 %v316_v5  ;;  %v286_v14 = vld [vmem:[%s1422_s29 + $0x8] sm:$0xff]  ;;  %v409_v17 = vld [vmem:[#allocation7 + $0x70] sm:$0xff]  ;;  %v311_v18 = vld [vmem:[#allocation5 + $0xc0] sm:$0xff]  ;;  %889 = vmatpush3.msra.mxu1 %v410_v16  ;;  %s1184_s24 = sshll.u32 %s1262_s22, 4  ;;  %s1185_s24 = int_to_ptr.vmem [resolvable:$false] %s1184_s24 }
  0x6b   : > { %807 = vmatpush3.msra.mxu0 %v300_v6  ;;  %v296_v15 = vld [vmem:[#allocation5 + $0x48] sm:$0xff]  ;;  %388 = vmatprep.mubr.f32.mxu0 %v286_v14  ;;  %v295_v19 = vld [vmem:[#allocation5 + $0x40] sm:$0xff]  ;;  %v310_v21 = vld [vmem:[#allocation5 + $0xb8] sm:$0xff]  ;;  %s1186_s26 = scalar_lea.vmem %s1185_s24, 256  ;;  %p1187_p3 = scmp.lt.s32.totalorder %s1503_s10, %s1185_s24 }
  0x6c   : > { %808 = vmatprep.subr.mxu0 %v315_v7  ;;  %890 = vmatprep.subr.mxu1 %v1260_v0  ;;  %v408_v20 = vld [vmem:[#allocation7 + $0x68] sm:$0xff]  ;;  %v294_v22 = vld [vmem:[#allocation5 + $0x38] sm:$0xff]  ;;  %v407_v23 = vld [vmem:[#allocation7 + $0x60] sm:$0xff] }
  0x6d   : > { %809 = vmatpush3.msra.mxu0 %v299_v8  ;;  %891 = vmatpush3.msra.mxu1 %v409_v17  ;;  %v309_v24 = vld [vmem:[#allocation5 + $0xb0] sm:$0xff]  ;;  %v406_v26 = vld [vmem:[#allocation7 + $0x58] sm:$0xff]  ;;  %v308_v27 = vld [vmem:[#allocation5 + $0xa8] sm:$0xff] }
  0x6e   : > { %810 = vmatprep.subr.mxu0 %v314_v9  ;;  %892 = vmatprep.subr.mxu1 %v1260_v0  ;;  %v293_v25 = vld [vmem:[#allocation5 + $0x30] sm:$0xff]  ;;  %v292_v28 = vld [vmem:[#allocation5 + $0x28] sm:$0xff]  ;;  %v307_v30 = vld [vmem:[#allocation5 + $0xa0] sm:$0xff] }
  0x6f   : > { %811 = vmatpush3.msra.mxu0 %v298_v10  ;;  %893 = vmatpush3.msra.mxu1 %v408_v20  ;;  %v405_v29 = vld [vmem:[#allocation7 + $0x50] sm:$0xff]  ;;  %v291_v31 = vld [vmem:[#allocation5 + $0x20] sm:$0xff]  ;;  %v404_v32 = vld [vmem:[#allocation7 + $0x48] sm:$0xff] }
  0x70   : > { %812 = vmatprep.subr.mxu0 %v313_v11  ;;  %894 = vmatprep.subr.mxu1 %v1260_v0  ;;  %v306_v33 = vld [vmem:[#allocation5 + $0x98] sm:$0xff]  ;;  %v403_v35 = vld [vmem:[#allocation7 + $0x40] sm:$0xff]  ;;  %v305_v36 = vld [vmem:[#allocation5 + $0x90] sm:$0xff] }
  0x71   : > { %813 = vmatpush3.msra.mxu0 %v297_v12  ;;  %895 = vmatpush3.msra.mxu1 %v407_v23  ;;  %v290_v34 = vld [vmem:[#allocation5 + $0x18] sm:$0xff]  ;;  %v289_v37 = vld [vmem:[#allocation5 + $0x10] sm:$0xff]  ;;  %v304_v39 = vld [vmem:[#allocation5 + $0x88] sm:$0xff] }
  0x72   : > { %814 = vmatprep.subr.mxu0 %v312_v13  ;;  %896 = vmatprep.subr.mxu1 %v1260_v0  ;;  %v402_v38 = vld [vmem:[#allocation7 + $0x38] sm:$0xff]  ;;  %v288_v40 = vld [vmem:[#allocation5 + $0x8] sm:$0xff]  ;;  %v401_v41 = vld [vmem:[#allocation7 + $0x30] sm:$0xff] }
  0x73   : > { %815 = vmatpush3.msra.mxu0 %v296_v15  ;;  %897 = vmatpush3.msra.mxu1 %v406_v26  ;;  %v303_v42 = vld [vmem:[#allocation5 + $0x80] sm:$0xff]  ;;  %v400_v44 = vld [vmem:[#allocation7 + $0x28] sm:$0xff]  ;;  %v398_v47 = vld [vmem:[#allocation7 + $0x18] sm:$0xff] }
  0x74   : > { %816 = vmatprep.subr.mxu0 %v311_v18  ;;  %898 = vmatprep.subr.mxu1 %v1260_v0  ;;  %v287_v43 = vld [vmem:[#allocation5] sm:$0xff]  ;;  %v397_v48 = vld [vmem:[#allocation7 + $0x10] sm:$0xff]  ;;  %v396_v49 = vld [vmem:[#allocation7 + $0x8] sm:$0xff] }
  0x75   : > { %817 = vmatpush3.msra.mxu0 %v295_v19  ;;  %899 = vmatpush3.msra.mxu1 %v405_v29  ;;  %v285_v45 = vld [vmem:[%s1422_s29] sm:$0xff]  ;;  %v503_v51 = vld [vmem:[#allocation7 + $0xf8] sm:$0xff]  ;;  %v501_v53 = vld [vmem:[#allocation7 + $0xe8] sm:$0xff]  ;;  %s1180_s29 = scalar_lea.vmem %s1503_s10, 128 }
  0x76   : > { %818 = vmatprep.subr.mxu0 %v310_v21  ;;  %900 = vmatprep.subr.mxu1 %v1260_v0  ;;  %v399_v46 = vld [vmem:[#allocation7 + $0x20] sm:$0xff]  ;;  %v502_v52 = vld [vmem:[#allocation7 + $0xf0] sm:$0xff]  ;;  %v499_v55 = vld [vmem:[#allocation7 + $0xd8] sm:$0xff]  ;;  %p1181_p4 = scmp.ne.s32.totalorder %s1503_s10, %s1180_s29  ;;  %p1188_p0 = scmp.lt.s32.totalorder %s1186_s26, %s1180_s29 }
  0x77   : > { %819 = vmatpush3.msra.mxu0 %v294_v22  ;;  %901 = vmatpush3.msra.mxu1 %v404_v32  ;;  %v395_v50 = vld [vmem:[#allocation7] sm:$0xff]  ;;  %v498_v56 = vld [vmem:[#allocation7 + $0xd0] sm:$0xff]  ;;  %v497_v57 = vld [vmem:[#allocation7 + $0xc8] sm:$0xff] }
  0x78   : > { %820 = vmatprep.subr.mxu0 %v309_v24  ;;  %902 = vmatprep.subr.mxu1 %v1260_v0  ;;  %v500_v54 = vld [vmem:[#allocation7 + $0xe0] sm:$0xff]  ;;  %v495_v59 = vld [vmem:[#allocation7 + $0xb8] sm:$0xff]  ;;  %v494_v60 = vld [vmem:[#allocation7 + $0xb0] sm:$0xff]  ;;  %p1182_p11 = pnand %p1181_p4, %p1571_p6  ;;  %p1189_p7 = por %p1188_p0, %p1187_p3 }
  0x79   : > { %821 = vmatpush3.msra.mxu0 %v293_v25  ;;  %903 = vmatpush3.msra.mxu1 %v403_v35  ;;  %v496_v58 = vld [vmem:[#allocation7 + $0xc0] sm:$0xff]  ;;  %v493_v61 = vld [vmem:[#allocation7 + $0xa8] sm:$0xff]  ;;  %v491_v63 = vld [vmem:[#allocation7 + $0x98] sm:$0xff] }
  0x7a   : > { %822 = vmatprep.subr.mxu0 %v308_v27  ;;  %904 = vmatprep.subr.mxu1 %v1260_v0  ;;  %v492_v62 = vld [vmem:[#allocation7 + $0xa0] sm:$0xff]  ;;  %v490_v7 = vld [vmem:[#allocation7 + $0x90] sm:$0xff]  ;;  %v489_v8 = vld [vmem:[#allocation7 + $0x88] sm:$0xff]  ;;  %p1183_p13 = pneg %p1182_p11 }
  0x7b   : > { %823 = vmatpush3.msra.mxu0 %v292_v28  ;;  %905 = vmatpush3.msra.mxu1 %v402_v38  ;;  %v794_v2 = vld [vmem:[%s1551_s3] ss:$0 sm:$0xff]  ;;  %v594_v10 = vld [vmem:[#allocation8 + $0x78] sm:$0xff]  ;;  %v593_v11 = vld [vmem:[#allocation8 + $0x70] sm:$0xff] }
  0x7c   : > { %824 = vmatprep.subr.mxu0 %v307_v30  ;;  %906 = vmatprep.subr.mxu1 %v1260_v0  ;;  %v488_v9 = vld [vmem:[#allocation7 + $0x80] sm:$0xff]  ;;  %v592_v12 = vld [vmem:[#allocation8 + $0x68] sm:$0xff]  ;;  %v590_v14 = vld [vmem:[#allocation8 + $0x58] sm:$0xff]  ;;  %p1190_p9 = pnand %p1189_p7, %p1183_p13 }
  0x7d   : > { %825 = vmatpush3.msra.mxu0 %v291_v31  ;;  %907 = vmatpush3.msra.mxu1 %v401_v41  ;;  %v591_v13 = vld [vmem:[#allocation8 + $0x60] sm:$0xff]  ;;  %v589_v15 = vld [vmem:[#allocation8 + $0x50] sm:$0xff]  ;;  %v588_v16 = vld [vmem:[#allocation8 + $0x48] sm:$0xff] }
  0x7e   : > { %826 = vmatprep.subr.mxu0 %v306_v33  ;;  %908 = vmatprep.subr.mxu1 %v1260_v0  ;;  %v587_v17 = vld [vmem:[#allocation8 + $0x40] sm:$0xff]  ;;  %v586_v18 = vld [vmem:[#allocation8 + $0x38] sm:$0xff]  ;;  %v585_v19 = vld [vmem:[#allocation8 + $0x30] sm:$0xff] }
  0x7f   : > { %827 = vmatpush3.msra.mxu0 %v290_v34  ;;  %909 = vmatpush3.msra.mxu1 %v400_v44  ;;  %v584_v20 = vld [vmem:[#allocation8 + $0x28] sm:$0xff]  ;;  %v583_v21 = vld [vmem:[#allocation8 + $0x20] sm:$0xff]  ;;  %v582_v22 = vld [vmem:[#allocation8 + $0x18] sm:$0xff] }
  0x80   : > { %828 = vmatprep.subr.mxu0 %v305_v36  ;;  %910 = vmatprep.subr.mxu1 %v1260_v0  ;;  %v581_v23 = vld [vmem:[#allocation8 + $0x10] sm:$0xff]  ;;  %v795_v24 = vld [vmem:[%s1551_s3 + $0x1] ss:$0 sm:$0xff]  ;;  %v580_v29 = vld [vmem:[#allocation8 + $0x8] sm:$0xff] }
  0x81   : > { %829 = vmatpush3.msra.mxu0 %v289_v37  ;;  %911 = vmatpush3.msra.mxu1 %v399_v46  ;;  %v579_v30 = vld [vmem:[#allocation8] sm:$0xff] }
  0x82   : > { %830 = vmatprep.subr.mxu0 %v304_v39  ;;  %912 = vmatprep.subr.mxu1 %v1260_v0  ;;  %v796_v31 = vld [vmem:[%s1551_s3 + $0x2] ss:$0 sm:$0xff] }
  0x83   : > { %831 = vmatpush3.msra.mxu0 %v288_v40  ;;  %913 = vmatpush3.msra.mxu1 %v398_v47 }
  0x84   : > { %832 = vmatprep.subr.mxu0 %v303_v42  ;;  %914 = vmatprep.subr.mxu1 %v1260_v0 }
  0x85   : > { %833 = vmatpush3.msra.mxu0 %v287_v43  ;;  %915 = vmatpush3.msra.mxu1 %v397_v48 }
  0x86   : > { %389 = vmatmul.mubr.f32.vlgmr.msra.gmra.mxu0 %v285_v45  ;;  %923 = vmatprep.subr.mxu0 %v1260_v0 }
  0x87   : > { %916 = vmatprep.subr.mxu1 %v1260_v0  ;;  %955 = vmatprep.mubr.msk.f32.mxu0 %vm1261_vm0, %v1260_v0 }
  0x88   : > { %917 = vmatpush3.msra.mxu1 %v396_v49  ;;  %924 = vmatpush3.msra.mxu0 %v503_v51 }
  0x89   : > { %918 = vmatprep.subr.mxu1 %v1260_v0  ;;  %925 = vmatprep.subr.mxu0 %v1260_v0 }
  0x8a   : > { %919 = vmatpush3.msra.mxu1 %v395_v50  ;;  %926 = vmatpush3.msra.mxu0 %v502_v52 }
  0x8b   : > { %958 = vmatprep.subr.mxu1 %v1260_v0  ;;  %927 = vmatprep.subr.mxu0 %v1260_v0 }
  0x8c   : > { %928 = vmatpush3.msra.mxu0 %v501_v53 }
  0x8d   : > { %929 = vmatprep.subr.mxu0 %v1260_v0 }
  0x8e   : > { %930 = vmatpush3.msra.mxu0 %v500_v54 }
  0x8f   : > { %931 = vmatprep.subr.mxu0 %v1260_v0 }
  0x90   : > { %932 = vmatpush3.msra.mxu0 %v499_v55 }
  0x91   : > { %933 = vmatprep.subr.mxu0 %v1260_v0 }
  0x92   : > { %934 = vmatpush3.msra.mxu0 %v498_v56 }
  0x93   : > { %935 = vmatprep.subr.mxu0 %v1260_v0 }
  0x94   : > { %936 = vmatpush3.msra.mxu0 %v497_v57 }
  0x95   : > { %937 = vmatprep.subr.mxu0 %v1260_v0 }
  0x96   : > { %938 = vmatpush3.msra.mxu0 %v496_v58 }
  0x97   : > { %939 = vmatprep.subr.mxu0 %v1260_v0 }
  0x98   : > { %940 = vmatpush3.msra.mxu0 %v495_v59 }
  0x99   : > { %941 = vmatprep.subr.mxu0 %v1260_v0 }
  0x9a   : > { %942 = vmatpush3.msra.mxu0 %v494_v60 }
  0x9b   : > { %943 = vmatprep.subr.mxu0 %v1260_v0 }
  0x9c   : > { %944 = vmatpush3.msra.mxu0 %v493_v61 }
  0x9d   : > { %945 = vmatprep.subr.mxu0 %v1260_v0 }
  0x9e   : > { %946 = vmatpush3.msra.mxu0 %v492_v62 }
  0x9f   : > { %947 = vmatprep.subr.mxu0 %v1260_v0 }
  0xa0   : > { %948 = vmatpush3.msra.mxu0 %v491_v63 }
  0xa1   : > { %949 = vmatprep.subr.mxu0 %v1260_v0 }
  0xa2   : > { %950 = vmatpush3.msra.mxu0 %v490_v7 }
  0xa3   : > { %951 = vmatprep.subr.mxu0 %v1260_v0 }
  0xa4   : > { %952 = vmatpush3.msra.mxu0 %v489_v8 }
  0xa5   : > { %953 = vmatprep.subr.mxu0 %v1260_v0 }
  0xa6   : > { %954 = vmatpush3.msra.mxu0 %v488_v9 }
 0x146   : > { %v834_v1 = vpop.f32.mrf.mxu0 }
 0x148   : > { %v835_v3 = vpop.f32.mrf.mxu0 }
 0x149   : > { %v836_v4 = vadd.f32 %v835_v3, %v834_v1 }
 0x14b   : > { %v391_v5 = vadd.f32 %v836_v4, %v794_v2 }
 0x14d   : > { %v394_v6 = vmax.f32 %v391_v5, 0.0 }
 0x14f   : > { %921 = vmatmul.mubr.f32.vlgmr.msra.gmra.mxu1 %v394_v6 }
 0x150   : > { %990 = vmatprep.mubr.msk.f32.mxu1 %vm1261_vm0, %v1260_v0  ;;  %959 = vmatpush3.msra.mxu1 %v594_v10 }
 0x151   : > { %960 = vmatprep.subr.mxu1 %v1260_v0 }
 0x152   : > { %961 = vmatpush3.msra.mxu1 %v593_v11 }
 0x153   : > { %962 = vmatprep.subr.mxu1 %v1260_v0 }
 0x154   : > { %963 = vmatpush3.msra.mxu1 %v592_v12 }
 0x155   : > { %964 = vmatprep.subr.mxu1 %v1260_v0 }
 0x156   : > { %965 = vmatpush3.msra.mxu1 %v591_v13 }
 0x157   : > { %966 = vmatprep.subr.mxu1 %v1260_v0 }
 0x158   : > { %967 = vmatpush3.msra.mxu1 %v590_v14 }
 0x159   : > { %968 = vmatprep.subr.mxu1 %v1260_v0 }
 0x15a   : > { %969 = vmatpush3.msra.mxu1 %v589_v15 }
 0x15b   : > { %970 = vmatprep.subr.mxu1 %v1260_v0 }
 0x15c   : > { %971 = vmatpush3.msra.mxu1 %v588_v16 }
 0x15d   : > { %972 = vmatprep.subr.mxu1 %v1260_v0 }
 0x15e   : > { %973 = vmatpush3.msra.mxu1 %v587_v17 }
 0x15f   : > { %974 = vmatprep.subr.mxu1 %v1260_v0 }
 0x160   : > { %975 = vmatpush3.msra.mxu1 %v586_v18 }
 0x161   : > { %976 = vmatprep.subr.mxu1 %v1260_v0 }
 0x162   : > { %977 = vmatpush3.msra.mxu1 %v585_v19 }
 0x163   : > { %978 = vmatprep.subr.mxu1 %v1260_v0 }
 0x164   : > { %979 = vmatpush3.msra.mxu1 %v584_v20 }
 0x165   : > { %980 = vmatprep.subr.mxu1 %v1260_v0 }
 0x166   : > { %981 = vmatpush3.msra.mxu1 %v583_v21 }
 0x167   : > { %982 = vmatprep.subr.mxu1 %v1260_v0 }
 0x168   : > { %983 = vmatpush3.msra.mxu1 %v582_v22 }
 0x169   : > { %984 = vmatprep.subr.mxu1 %v1260_v0 }
 0x16a   : > { %985 = vmatpush3.msra.mxu1 %v581_v23 }
 0x16b   : > { %986 = vmatprep.subr.mxu1 %v1260_v0 }
 0x16c   : > { %987 = vmatpush3.msra.mxu1 %v580_v29 }
 0x16d   : > { %988 = vmatprep.subr.mxu1 %v1260_v0 }
 0x16e   : > { %989 = vmatpush3.msra.mxu1 %v579_v30 }
 0x20f   : > { %v482_v25 = vpop.f32.mrf.mxu1 }
 0x210   : > { %v483_v26 = vadd.f32 %v795_v24, %v482_v25 }
 0x211   : > { %v922_v27 = vpop.f32.mrf.mxu1 }
 0x212   : > { %v486_v28 = vmax.f32 %v483_v26, 0.0 }
 0x214   : > { %956 = vmatmul.mubr.f32.vlgmr.msra.gmra.mxu0 %v486_v28 }
 0x2d4   : > { %v575_v32 = vpop.f32.mrf.mxu0 }
 0x2d5   : > { %v576_v33 = vadd.f32 %v796_v31, %v575_v32 }
 0x2d6   : > { %v957_v34 = vpop.f32.mrf.mxu0 }
 0x2d7   : > { %991 = vmatmul.mubr.f32.vlgmr.msra.gmra.mxu1 %v576_v33 }
 0x397   : > { %v661_v0 = vpop.f32.mrf.mxu1 }
 0x398   : > { %665 = vst [vmem:[%s284_s8] sm:$0xff] %v661_v0 }
 0x399   : > { %v992_v35 = vpop.f32.mrf.mxu1 }
 0x39a   : > { %1193 = shalt.err (!%p1190_p9)
}
 0x39b   : > { %s1194_s13 = scalar_lea.hbm %s1508_s27, 128  ;;  %s1198_s16 = scalar_lea.hbm %s1553_s5, 384 }
 0x39c   : > { %p1195_p12 = scmp.ne.s32.totalorder %s1508_s27, %s1194_s13  ;;  %p1199_p5 = scmp.lt.s32.totalorder %s1508_s27, %s1553_s5 }
 0x39d   : > { %p1200_p10 = scmp.lt.s32.totalorder %s1198_s16, %s1194_s13 }
 0x39e   : > { %p1196_p1 = pnand %p1195_p12, %p1571_p6 }
 0x39f   : > { %p1201_p2 = por %p1200_p10, %p1199_p5 }
 0x3a0   : > { %p1197_p8 = pneg %p1196_p1 }
 0x3a2   : > { %p1202_p4 = pnand %p1201_p2, %p1197_p8 }
 0x3a4   : > { %1205 = shalt.err (!%p1202_p4)
}
 0x3a5   : > { %1007 = dma.vmem_to_hbm [thread:$0]  (%p1571_p6), %s1503_s10, 128, %s1508_s27, %s667_s30  }
 0x3a6 PF: > { %p1034_p11 = scmp.ge.s32.totalorder %s1252_s21, 2  ;;  %s692_s8 = sand.u32 1, %s1240_s18  }
 0x3a7   : > { %p1572_p13 = scmp.ne.s32.totalorder %s1559_s25, 0  ;;  %s693_s9 = scalar_lea.sflag [#allocation4], %s692_s8 }
 0x3a9   : > { %p1024_p3 = pnand %p1034_p11, %p1572_p13 }
 0x3ab   : > { %p1025_p0 = pneg %p1024_p3 }
 0x3ad   : > { %1235 = dma.done.wait (%p1025_p0), %s693_s9, 128  }
 0x3ae   : > { %1237 = vsyncadd (%p1025_p0), %s693_s9, 4294967168  ;;  %p20_p7 = scmp.ge.s32.totalorder %s1372_s28, 5   ;;  %s1573_s18 = smov %s1244_s19 }
 0x3af   : > { %s1574_s19 = smov %s1248_s20  ;;  %s1575_s20 = smov %s1382_s6 }
 0x3b0   : > { %s1576_s21 = smov %s1372_s28  ;;  %22 = sbr.rel (!%p20_p7) target bundleno = 7 (0x7), region = 98 }
 0x3b5   :  { %698 = vsyncpa [#allocation3], 1 }
 0x3b6   :  { %700 = vsyncpa [#allocation3 + $0x1], 1 }
 0x3b7   :  { %701 = vsyncpa [#allocation6], 1 }
 0x3b8   :  { %702 = vsyncpa [#allocation9], 1 }
 0x3b9   :  { %703 = vsyncpa [#allocation4], 1 }
 0x3ba   :  { %705 = vsyncpa [#allocation4 + $0x1], 1 }

</bundles_post_ra>
